<compile_context>
chip_gen: v7x
topology: tpu7x:2x2x1
jax: 0.10.0
libtpu: 0.0.40
codegen_flags: <defaults>
</compile_context>

<pallas_src>
import functools

import jax
import jax.numpy as jnp
from jax import lax
from jax.experimental import pallas as pl
from jax.experimental.pallas import tpu as pltpu

LANE = 128
SUBLANE = 8


# ---------------------------------------------------------------------------
# Fused Pallas kernel: conv stack (as matmuls) + SiLU + global average pool
# ---------------------------------------------------------------------------
def _silu(x):
    # sigmoid = 1/(1+exp(-x)); exp and the approx reciprocal both run on the
    # EUP slot, keeping the epilogue off the VALU slots that contend with
    # loads/stores once the kernel is pipelined.
    return x * pl.reciprocal(1.0 + jnp.exp(-x), approx=True)


def _fused_fext_kernel(x_ref, w0_ref, b0_ref, w1_ref, b1_ref, w2_ref, b2_ref,
                       o_ref, acc_ref, *, s_valid, tile_m, needs_mask):
    """One spatial M-tile of one batch element.

    x_ref : (1, tile_m, Kp) bf16 im2col patches of the stem conv
    w*_ref: bf16 weights (resident in VMEM, constant index_map)
    b*_ref: f32 folded-BN biases
    o_ref : (1, 1, F) f32 pooled features (written once, at the last tile)
    acc_ref: (1, F) f32 running spatial sum (scratch, persists across grid)
    """
    s = pl.program_id(1)

    @pl.when(s == 0)
    def _init():
        acc_ref[...] = jnp.zeros_like(acc_ref)

    x = x_ref[0]                                                  # (tm, Kp) bf16
    # Stem 3x3 conv (im2col matmul) + folded-BN bias + SiLU
    h = jnp.dot(x, w0_ref[...], preferred_element_type=jnp.float32)
    h = _silu(h + b0_ref[...])
    # Fused 1x1 "MBConv stand-in" conv + SiLU
    h = jnp.dot(h.astype(jnp.bfloat16), w1_ref[...],
                preferred_element_type=jnp.float32)
    h = _silu(h + b1_ref[...])
    # Fused 1x1 head conv to the feature dim + SiLU
    h = jnp.dot(h.astype(jnp.bfloat16), w2_ref[...],
                preferred_element_type=jnp.float32)
    h = _silu(h + b2_ref[...])                                    # (tm, F) f32

    if needs_mask:  # static: only emitted when the spatial axis was padded
        row = s * tile_m + lax.broadcasted_iota(jnp.int32, (tile_m, 1), 0)
        h = jnp.where(row < s_valid, h, 0.0)

    # Fused global-average-pool: accumulate per-batch partial sums.
    acc_ref[...] += jnp.sum(h, axis=0, keepdims=True)             # (1, F)

    @pl.when(s == pl.num_programs(1) - 1)
    def _finalize():
        o_ref[0] = (acc_ref[...] * (1.0 / s_valid)).astype(o_ref.dtype)


def fused_conv_stack_avgpool(patches, w0, b0, w1, b1, w2, b2, *,
                             s_valid, tile_m):
    """patches: (B, S_pad, Kp) bf16.  Returns (B, F) f32 pooled features."""
    B, s_pad, kp = patches.shape
    F = w2.shape[1]
    assert s_pad % tile_m == 0
    n_s = s_pad // tile_m

    kernel = functools.partial(
        _fused_fext_kernel, s_valid=s_valid, tile_m=tile_m,
        needs_mask=(s_pad != s_valid))

    out = pl.pallas_call(
        kernel,
        out_shape=jax.ShapeDtypeStruct((B, 1, F), jnp.float32),
        grid=(B, n_s),
        in_specs=[
            # activations: tiled over batch and spatial rows (double-buffered)
            pl.BlockSpec((1, tile_m, kp), lambda b, s: (b, s, 0)),
            # weights / biases: full blocks, constant index_map -> VMEM-resident
            pl.BlockSpec(w0.shape, lambda b, s: (0, 0)),
            pl.BlockSpec(b0.shape, lambda b, s: (0, 0)),
            pl.BlockSpec(w1.shape, lambda b, s: (0, 0)),
            pl.BlockSpec(b1.shape, lambda b, s: (0, 0)),
            pl.BlockSpec(w2.shape, lambda b, s: (0, 0)),
            pl.BlockSpec(b2.shape, lambda b, s: (0, 0)),
        ],
        # lane-dense (.., 128) output, revisited across the spatial axis
        out_specs=pl.BlockSpec((1, 1, F), lambda b, s: (b, 0, 0)),
        scratch_shapes=[pltpu.VMEM((1, F), jnp.float32)],
        compiler_params=pltpu.CompilerParams(
            dimension_semantics=("parallel", "arbitrary"),
            vmem_limit_bytes=32 * 1024 * 1024),
    )(patches, w0, b0, w1, b1, w2, b2)
    return out.reshape(B, F)


# ---------------------------------------------------------------------------
# Glue: im2col (stem only), parameter init, forward
# ---------------------------------------------------------------------------
def _im2col(x_nhwc, kh, kw, stride, pad):
    B, H, W, C = x_nhwc.shape
    xp = jnp.pad(x_nhwc, ((0, 0), (pad, pad), (pad, pad), (0, 0)))
    Ho = (H + 2 * pad - kh) // stride + 1
    Wo = (W + 2 * pad - kw) // stride + 1
    cols = []
    for i in range(kh):
        for j in range(kw):
            cols.append(xp[:, i:i + stride * Ho:stride,
                           j:j + stride * Wo:stride, :])
    patches = jnp.concatenate(cols, axis=-1)          # (B, Ho, Wo, kh*kw*C)
    return patches.reshape(B, Ho * Wo, kh * kw * C)


def init_params(key, c_in=3, c_stem=32, c_mid=64, c_feat=128):
    k = jax.random.split(key, 6)

    def w(kk, shape):
        return (jax.random.normal(kk, shape, jnp.float32)
                / jnp.sqrt(jnp.float32(shape[0]))).astype(jnp.bfloat16)

    def b(kk, n):
        return jax.random.normal(kk, (1, n), jnp.float32) * 0.1

    return {
        "stem_w": w(k[0], (3 * 3 * c_in, c_stem)),   # bf16 (MXU-native)
        "stem_b": b(k[1], c_stem),                   # f32 folded-BN bias
        "mid_w":  w(k[2], (c_stem, c_mid)),
        "mid_b":  b(k[3], c_mid),
        "head_w": w(k[4], (c_mid, c_feat)),
        "head_b": b(k[5], c_feat),
    }


def fext_forward(params, x_nchw):
    """Pallas equivalent of FExt.forward: returns {'final': [B, F]}."""
    x = jnp.transpose(x_nchw, (0, 2, 3, 1)).astype(jnp.float32)   # NCHW -> NHWC

    # Stem 3x3 stride-2 conv lowered to an im2col matmul.
    # TODO(synk): for full EfficientNet-B7 inputs, express the 3x3 patch
    # extraction through the BlockSpec index_map instead of materializing the
    # im2col matrix in HBM.
    patches = _im2col(x, 3, 3, 2, 1)                  # (B, S, 27)
    B, S, K = patches.shape

    # Pad the contraction axis to a lane multiple (27 -> 128): aligned MXU feeds.
    w0 = params["stem_w"]
    Kp = ((K + LANE - 1) // LANE) * LANE
    if Kp != K:
        patches = jnp.pad(patches, ((0, 0), (0, 0), (0, Kp - K)))
        w0 = jnp.pad(w0, ((0, Kp - K), (0, 0)))

    # Pad spatial rows to the M-tile; the kernel masks the padded rows before
    # accumulating into the pooled sum.
    tile_m = min(512, ((S + SUBLANE - 1) // SUBLANE) * SUBLANE)
    S_pad = ((S + tile_m - 1) // tile_m) * tile_m
    if S_pad != S:
        patches = jnp.pad(patches, ((0, 0), (0, S_pad - S), (0, 0)))
    patches = patches.astype(jnp.bfloat16)            # halve HBM bytes for x

    feats = fused_conv_stack_avgpool(
        patches, w0, params["stem_b"], params["mid_w"], params["mid_b"],
        params["head_w"], params["head_b"], s_valid=S, tile_m=tile_m)
    # The reference forward breaks at the 'final' layer, so only it is returned.
    return {"final": feats}


if __name__ == "__main__":
    key = jax.random.PRNGKey(0)
    pkey, xkey = jax.random.split(key)
    params = init_params(pkey)
    x = jax.random.normal(xkey, (2, 3, 16, 16), jnp.float32)      # NCHW, like PyTorch
    out = jax.jit(fext_forward)(params, x)
    feats = jax.block_until_ready(out["final"])
    assert feats.shape == (2, 128) and feats.dtype == jnp.float32
    assert bool(jnp.all(jnp.isfinite(feats)))
    print("KERNEL_OK")
</pallas_src>

<mosaic_0001>
module attributes {stable_mosaic.version = 11 : i64} {
  func.func @_fused_fext_kernel(%arg0: i32, %arg1: i32, %arg2: memref<1x64x128xbf16, #tpu.memory_space<vmem>>, %arg3: memref<128x32xbf16, #tpu.memory_space<vmem>>, %arg4: memref<1x32xf32, #tpu.memory_space<vmem>>, %arg5: memref<32x64xbf16, #tpu.memory_space<vmem>>, %arg6: memref<1x64xf32, #tpu.memory_space<vmem>>, %arg7: memref<64x128xbf16, #tpu.memory_space<vmem>>, %arg8: memref<1x128xf32, #tpu.memory_space<vmem>>, %arg9: memref<1x1x128xf32, #tpu.memory_space<vmem>>, %arg10: memref<1x128xf32, #tpu.memory_space<vmem>>) attributes {dimension_semantics = [#tpu.dimension_semantics<parallel>, #tpu.dimension_semantics<arbitrary>], iteration_bounds = array<i64: 2, 1>, scalar_prefetch = 0 : i64, scratch_operands = 1 : i64, tpu.core_type = #tpu.core_type<tc>, window_params = [{transform_indices = @transform_0, window_bounds = array<i64: 1, 64, 128>}, {pipeline_mode = #tpu.pipeline_mode<synchronous>, transform_indices = @transform_1, window_bounds = array<i64: 128, 32>}, {pipeline_mode = #tpu.pipeline_mode<synchronous>, transform_indices = @transform_2, window_bounds = array<i64: 1, 32>}, {pipeline_mode = #tpu.pipeline_mode<synchronous>, transform_indices = @transform_3, window_bounds = array<i64: 32, 64>}, {pipeline_mode = #tpu.pipeline_mode<synchronous>, transform_indices = @transform_4, window_bounds = array<i64: 1, 64>}, {pipeline_mode = #tpu.pipeline_mode<synchronous>, transform_indices = @transform_5, window_bounds = array<i64: 64, 128>}, {pipeline_mode = #tpu.pipeline_mode<synchronous>, transform_indices = @transform_6, window_bounds = array<i64: 1, 128>}, {transform_indices = @transform_7, window_bounds = array<i64: 1, 1, 128>}]} {
    %c0_i32 = arith.constant 0 : i32
    %0 = arith.cmpi eq, %arg1, %c0_i32 : i32
    %1 = arith.extui %0 : i1 to i32
    %c0_i32_0 = arith.constant 0 : i32
    %2 = arith.cmpi ne, %1, %c0_i32_0 : i32
    scf.if %2 {
      %cst_30 = arith.constant 0.000000e+00 : f32
      %51 = vector.broadcast %cst_30 : f32 to vector<1x128xf32>
      %c0_31 = arith.constant 0 : index
      %c0_32 = arith.constant 0 : index
      %52 = vector.load %arg10[%c0_31, %c0_32] : memref<1x128xf32, #tpu.memory_space<vmem>>, vector<1x128xf32>
      tpu.vector_store %arg10[%c0_31, %c0_32], %51 {strides = array<i32>} : memref<1x128xf32, #tpu.memory_space<vmem>>, vector<1x128xf32>,
    } else {
    }
    %c0 = arith.constant 0 : index
    %c0_1 = arith.constant 0 : index
    %c0_2 = arith.constant 0 : index
    %3 = vector.load %arg2[%c0, %c0_1, %c0_2] : memref<1x64x128xbf16, #tpu.memory_space<vmem>>, vector<1x64x128xbf16>
    %4 = vector.shape_cast %3 : vector<1x64x128xbf16> to vector<64x128xbf16>
    %c0_3 = arith.constant 0 : index
    %c0_4 = arith.constant 0 : index
    %5 = vector.load %arg3[%c0_3, %c0_4] : memref<128x32xbf16, #tpu.memory_space<vmem>>, vector<128x32xbf16>
    %cst = arith.constant dense<0.000000e+00> : vector<64x32xf32>
    %6 = tpu.matmul %4, %5, %cst {dimension_numbers = #tpu.dot_dimension_numbers<[1], [0], [0], [1], [0, 0, 1, 1], [], []>} : vector<64x128xbf16>, vector<128x32xbf16>, vector<64x32xf32> -> vector<64x32xf32>
    %c0_5 = arith.constant 0 : index
    %c0_6 = arith.constant 0 : index
    %7 = vector.load %arg4[%c0_5, %c0_6] : memref<1x32xf32, #tpu.memory_space<vmem>>, vector<1x32xf32>
    %8 = vector.broadcast %7 : vector<1x32xf32> to vector<64x32xf32>
    %9 = arith.addf %6, %8 : vector<64x32xf32>
    %cst_7 = arith.constant 0.000000e+00 : f32
    %10 = vector.broadcast %cst_7 : f32 to vector<64x32xf32>
    %11 = arith.subf %10, %9 : vector<64x32xf32>
    %12 = math.exp %11 : vector<64x32xf32>
    %cst_8 = arith.constant 1.000000e+00 : f32
    %13 = vector.broadcast %cst_8 : f32 to vector<64x32xf32>
    %14 = arith.addf %13, %12 : vector<64x32xf32>
    %15 = tpu.reciprocal %14 {approx = true} : vector<64x32xf32> -> vector<64x32xf32>
    %16 = arith.mulf %9, %15 : vector<64x32xf32>
    %17 = arith.truncf %16 : vector<64x32xf32> to vector<64x32xbf16>
    %c0_9 = arith.constant 0 : index
    %c0_10 = arith.constant 0 : index
    %18 = vector.load %arg5[%c0_9, %c0_10] : memref<32x64xbf16, #tpu.memory_space<vmem>>, vector<32x64xbf16>
    %cst_11 = arith.constant dense<0.000000e+00> : vector<64x64xf32>
    %19 = tpu.matmul %17, %18, %cst_11 {dimension_numbers = #tpu.dot_dimension_numbers<[1], [0], [0], [1], [0, 0, 1, 1], [], []>} : vector<64x32xbf16>, vector<32x64xbf16>, vector<64x64xf32> -> vector<64x64xf32>
    %c0_12 = arith.constant 0 : index
    %c0_13 = arith.constant 0 : index
    %20 = vector.load %arg6[%c0_12, %c0_13] : memref<1x64xf32, #tpu.memory_space<vmem>>, vector<1x64xf32>
    %21 = vector.broadcast %20 : vector<1x64xf32> to vector<64x64xf32>
    %22 = arith.addf %19, %21 : vector<64x64xf32>
    %cst_14 = arith.constant 0.000000e+00 : f32
    %23 = vector.broadcast %cst_14 : f32 to vector<64x64xf32>
    %24 = arith.subf %23, %22 : vector<64x64xf32>
    %25 = math.exp %24 : vector<64x64xf32>
    %cst_15 = arith.constant 1.000000e+00 : f32
    %26 = vector.broadcast %cst_15 : f32 to vector<64x64xf32>
    %27 = arith.addf %26, %25 : vector<64x64xf32>
    %28 = tpu.reciprocal %27 {approx = true} : vector<64x64xf32> -> vector<64x64xf32>
    %29 = arith.mulf %22, %28 : vector<64x64xf32>
    %30 = arith.truncf %29 : vector<64x64xf32> to vector<64x64xbf16>
    %c0_16 = arith.constant 0 : index
    %c0_17 = arith.constant 0 : index
    %31 = vector.load %arg7[%c0_16, %c0_17] : memref<64x128xbf16, #tpu.memory_space<vmem>>, vector<64x128xbf16>
    %cst_18 = arith.constant dense<0.000000e+00> : vector<64x128xf32>
    %32 = tpu.matmul %30, %31, %cst_18 {dimension_numbers = #tpu.dot_dimension_numbers<[1], [0], [0], [1], [0, 0, 1, 1], [], []>} : vector<64x64xbf16>, vector<64x128xbf16>, vector<64x128xf32> -> vector<64x128xf32>
    %c0_19 = arith.constant 0 : index
    %c0_20 = arith.constant 0 : index
    %33 = vector.load %arg8[%c0_19, %c0_20] : memref<1x128xf32, #tpu.memory_space<vmem>>, vector<1x128xf32>
    %34 = vector.broadcast %33 : vector<1x128xf32> to vector<64x128xf32>
    %35 = arith.addf %32, %34 : vector<64x128xf32>
    %cst_21 = arith.constant 0.000000e+00 : f32
    %36 = vector.broadcast %cst_21 : f32 to vector<64x128xf32>
    %37 = arith.subf %36, %35 : vector<64x128xf32>
    %38 = math.exp %37 : vector<64x128xf32>
    %cst_22 = arith.constant 1.000000e+00 : f32
    %39 = vector.broadcast %cst_22 : f32 to vector<64x128xf32>
    %40 = arith.addf %39, %38 : vector<64x128xf32>
    %41 = tpu.reciprocal %40 {approx = true} : vector<64x128xf32> -> vector<64x128xf32>
    %42 = arith.mulf %35, %41 : vector<64x128xf32>
    %c0_23 = arith.constant 0 : index
    %c0_24 = arith.constant 0 : index
    %43 = vector.load %arg10[%c0_23, %c0_24] : memref<1x128xf32, #tpu.memory_space<vmem>>, vector<1x128xf32>
    %cst_25 = arith.constant dense<0.000000e+00> : vector<128xf32>
    %44 = vector.multi_reduction <add>, %42, %cst_25 [0] : vector<64x128xf32> to vector<128xf32>
    %45 = vector.shape_cast %44 : vector<128xf32> to vector<1x128xf32>
    %46 = arith.addf %43, %45 : vector<1x128xf32>
    %c0_26 = arith.constant 0 : index
    %c0_27 = arith.constant 0 : index
    %47 = vector.load %arg10[%c0_26, %c0_27] : memref<1x128xf32, #tpu.memory_space<vmem>>, vector<1x128xf32>
    tpu.vector_store %arg10[%c0_26, %c0_27], %46 {strides = array<i32>} : memref<1x128xf32, #tpu.memory_space<vmem>>, vector<1x128xf32>,
    %c0_i32_28 = arith.constant 0 : i32
    %48 = arith.cmpi eq, %arg1, %c0_i32_28 : i32
    %49 = arith.extui %48 : i1 to i32
    %c0_i32_29 = arith.constant 0 : i32
    %50 = arith.cmpi ne, %49, %c0_i32_29 : i32
    scf.if %50 {
      %c0_30 = arith.constant 0 : index
      %c0_31 = arith.constant 0 : index
      %51 = vector.load %arg10[%c0_30, %c0_31] : memref<1x128xf32, #tpu.memory_space<vmem>>, vector<1x128xf32>
      %cst_32 = arith.constant 1.562500e-02 : f32
      %52 = vector.broadcast %cst_32 : f32 to vector<1x128xf32>
      %53 = arith.mulf %51, %52 : vector<1x128xf32>
      %c0_33 = arith.constant 0 : index
      %c0_34 = arith.constant 0 : index
      %c0_35 = arith.constant 0 : index
      %54 = vector.load %arg9[%c0_33, %c0_34, %c0_35] : memref<1x1x128xf32, #tpu.memory_space<vmem>>, vector<1x1x128xf32>
      %55 = vector.shape_cast %54 : vector<1x1x128xf32> to vector<1x128xf32>
      %56 = vector.shape_cast %53 : vector<1x128xf32> to vector<1x1x128xf32>
      tpu.vector_store %arg9[%c0_33, %c0_34, %c0_35], %56 {strides = array<i32>} : memref<1x1x128xf32, #tpu.memory_space<vmem>>, vector<1x1x128xf32>,
    } else {
    }
    return
  }
  func.func @transform_0(%arg0: i32, %arg1: i32) -> (i32, i32, i32) {
    %c0_i32 = arith.constant 0 : i32
    %c0_i32_0 = arith.constant 0 : i32
    return %arg0, %arg1, %c0_i32 : i32, i32, i32
  }
  func.func @transform_1(%arg0: i32, %arg1: i32) -> (i32, i32) {
    %c0_i32 = arith.constant 0 : i32
    %c0_i32_0 = arith.constant 0 : i32
    %c0_i32_1 = arith.constant 0 : i32
    return %c0_i32, %c0_i32_0 : i32, i32
  }
  func.func @transform_2(%arg0: i32, %arg1: i32) -> (i32, i32) {
    %c0_i32 = arith.constant 0 : i32
    %c0_i32_0 = arith.constant 0 : i32
    %c0_i32_1 = arith.constant 0 : i32
    return %c0_i32, %c0_i32_0 : i32, i32
  }
  func.func @transform_3(%arg0: i32, %arg1: i32) -> (i32, i32) {
    %c0_i32 = arith.constant 0 : i32
    %c0_i32_0 = arith.constant 0 : i32
    %c0_i32_1 = arith.constant 0 : i32
    return %c0_i32, %c0_i32_0 : i32, i32
  }
  func.func @transform_4(%arg0: i32, %arg1: i32) -> (i32, i32) {
    %c0_i32 = arith.constant 0 : i32
    %c0_i32_0 = arith.constant 0 : i32
    %c0_i32_1 = arith.constant 0 : i32
    return %c0_i32, %c0_i32_0 : i32, i32
  }
  func.func @transform_5(%arg0: i32, %arg1: i32) -> (i32, i32) {
    %c0_i32 = arith.constant 0 : i32
    %c0_i32_0 = arith.constant 0 : i32
    %c0_i32_1 = arith.constant 0 : i32
    return %c0_i32, %c0_i32_0 : i32, i32
  }
  func.func @transform_6(%arg0: i32, %arg1: i32) -> (i32, i32) {
    %c0_i32 = arith.constant 0 : i32
    %c0_i32_0 = arith.constant 0 : i32
    %c0_i32_1 = arith.constant 0 : i32
    return %c0_i32, %c0_i32_0 : i32, i32
  }
  func.func @transform_7(%arg0: i32, %arg1: i32) -> (i32, i32, i32) {
    %c0_i32 = arith.constant 0 : i32
    %c0_i32_0 = arith.constant 0 : i32
    %c0_i32_1 = arith.constant 0 : i32
    return %arg0, %c0_i32, %c0_i32_0 : i32, i32, i32
  }
}

</mosaic_0001>

<bundles_post_ra>
// kernel: fext_forward.1
= control target key start
LH: loop header
LB: loop body
LE: loop exit
PB: predicated region body
PF: predicated region fallthrough
CT: control target
= control target key end

     0   :  { %12 = vsyncpa [#allocation4], 0  ;;  %s1561_s0 = inlined_call_operand.vmem [shape: bf16[2,64,128], index: 0, kind: input, shape index: {}]   ;;  %s1562_s1 = inlined_call_operand.vmem [shape: bf16[128,32], index: 1, kind: input, shape index: {}]   ;;  %s1563_s2 = inlined_call_operand.vmem [shape: f32[1,32], index: 2, kind: input, shape index: {}]   ;;  %s1564_s3 = inlined_call_operand.vmem [shape: bf16[32,64], index: 3, kind: input, shape index: {}]   ;;  %s1565_s4 = inlined_call_operand.vmem [shape: f32[1,64], index: 4, kind: input, shape index: {}]   ;;  %s1566_s5 = inlined_call_operand.vmem [shape: bf16[64,128], index: 5, kind: input, shape index: {}]   ;;  %s1567_s6 = inlined_call_operand.vmem [shape: f32[1,128], index: 6, kind: input, shape index: {}]   ;;  %s1568_s7 = inlined_call_operand.hbm [shape: f32[2,1,128], index: 7, kind: output, shape index: {}]  }
   0x1   :  { %14 = vsyncpa [#allocation4 + $0x1], 0  ;;  %s1362_s24 = smov 0   ;;  %s1364_s25 = smov 0  }
   0x2   :  { %s1366_s26 = smov 0   ;;  %s1368_s27 = smov 0  }
   0x3   :  { %s1370_s28 = smov 0   ;;  %s1372_s29 = smov 0  }
   0x4 LB: > { %s952_s30 = sadd.s32 4294967295, %s1318_s29   ;;  %s953_s8 = sadd.s32 4294967294, %s1318_s29   ;;  %s1318_s29 = sphi %s1372_s29, %s20_s29   ;;  %s1314_s28 = sphi %s1370_s28, %s1575_s28   ;;  %s1310_s27 = sphi %s1368_s27, %s1574_s27   ;;  %s1306_s26 = sphi %s1366_s26, %s1573_s26   ;;  %s1302_s25 = sphi %s1364_s25, %s1572_s25   ;;  %s1298_s24 = sphi %s1362_s24, %s1571_s24  }
   0x5   : > { %s32_s9 = sadd.s32 1, %s1314_s28  ;;  %s193_s10 = sadd.s32 1, %s1306_s26 }
   0x6   : > { %p34_p0 = scmp.ge.s32.totalorder %s32_s9, 2  ;;  %p203_p1 = scmp.ne.s32.totalorder %s1306_s26, %s1302_s25 }
   0x7   : > { %p204_p2 = scmp.eq.s32.totalorder %s952_s30, 1  ;;  %p209_p3 = scmp.ne.s32.totalorder %s1302_s25, %s1298_s24 }
   0x8   : > { %s1577_s9 = smov (%p34_p0, %s32_s9), 0  ;;  %p210_p5 = scmp.eq.s32.totalorder %s953_s8, 1 }
   0x9   : > { %p1402_p4 = por %p204_p2, %p203_p1  ;;  %s190_s12 = ssub.s32 %s1314_s28, %s1577_s9 }
   0xa   : > { %p956_p6 = scmp.ge.s32.totalorder %s1318_s29, 1  ;;  %p191_p7 = scmp.eq.s32.totalorder %s190_s12, 0 }
   0xb   : > { %p1409_p8 = por %p210_p5, %p209_p3  ;;  %p259_p9 = scmp.lt.s32.totalorder %s1318_s29, 3 }
   0xc   : > { %s1415_s14 = scalar_select %p191_p7, %s1306_s26, %s193_s10  }
   0xd   : > { %p260_p10 = pnand %p956_p6, %p259_p9 }
   0xe   : > { %v1126_v0 = vld [vmem:[%s1562_s1] sm:$0xff] (!%p260_p10)   ;;  %p295_p11 = scmp.lt.s32.totalorder (!%p260_p10), %s1310_s27, 1  ;;  %v1127_v1 = vld [vmem:[%s1562_s1 + $0x8] sm:$0xff] (!%p260_p10)   ;;  %v1128_v2 = vld [vmem:[%s1562_s1 + $0x10] sm:$0xff] (!%p260_p10)   ;;  %vm553_vm0 = vcmask (!%p260_p10), 261120   ;;  %vm722_vm1 = vcmask (!%p260_p10), 523264  }
   0xf   : > { %263 = sbr.rel (%p260_p10) target bundleno = 846 (0x34e), region = 48  ;;  %1018 = vmatprep.subr.bf16.mxu0 (!%p260_p10), %v1126_v0  ;;  %v1129_v3 = vld [vmem:[%s1562_s1 + $0x18] sm:$0xff] (!%p260_p10)   ;;  %v1130_v5 = vld [vmem:[%s1562_s1 + $0x20] sm:$0xff] (!%p260_p10)   ;;  %v1131_v6 = vld [vmem:[%s1562_s1 + $0x28] sm:$0xff] (!%p260_p10)   ;;  %s292_s16 = sand.u32 (!%p260_p10), 1, %s1302_s25  }
  0x10   : > { %1019 = vmatpush3.bf16.msra.mxu0 (!%p260_p10), %v1126_v0  ;;  %v1132_v7 = vld [vmem:[%s1562_s1 + $0x30] sm:$0xff] (!%p260_p10)   ;;  %v1133_v8 = vld [vmem:[%s1562_s1 + $0x38] sm:$0xff] (!%p260_p10)   ;;  %v1138_v12 = vld [vmem:[%s1564_s3] sm:$0xff] (!%p260_p10)   ;;  %s293_s17 = scalar_lea.vmem (!%p260_p10), [#allocation3], %s292_s16 }
  0x11   : > { %1020 = vmatprep.subr.bf16.mxu0 (!%p260_p10), %v1127_v1  ;;  %1042 = vmatprep.subr.bf16.mxu1 (!%p260_p10), %v1138_v12  ;;  %v1139_v13 = vld [vmem:[%s1564_s3 + $0x8] sm:$0xff] (!%p260_p10)   ;;  %v959_v14 = vld [vmem:[%s1563_s2] ss:$0 sm:$0xff] (!%p260_p10)  ;;  %s883_s18 = sshll.u32 (!%p260_p10), %s293_s17, 4  ;;  %s1516_s18 = int_to_ptr.vmem [resolvable:$true] %s883_s18 }
  0x12   : > { %1043 = vmatpush3.bf16.msra.mxu1 (!%p260_p10), %v1138_v12  ;;  %s1240_s23 = scalar_lea.vmem (!%p260_p10), %s1516_s18, 16 }
  0x13   : > { %1044 = vmatprep.subr.bf16.mxu1 (!%p260_p10), %v1139_v13  ;;  %p1241_p12 = scmp.ne.s32.totalorder (!%p260_p10), %s1516_s18, %s1240_s23 }
  0x14   : > { %1021 = vmatpush3.bf16.msra.mxu0 (!%p260_p10), %v1127_v1 }
  0x15   : > { %1022 = vmatprep.subr.bf16.mxu0 (!%p260_p10), %v1128_v2  ;;  %p1242_p13 = pnand (!%p260_p10), %p1241_p12, %p1402_p4 }
  0x16   : > { %s296_s19 = scalar_select %p295_p11, %s1310_s27, 1  ;;  %1045 = vmatpush3.bf16.msra.mxu1 %v1139_v13 }
  0x17   : > { %p1243_p0 = pneg %p1242_p13 }
  0x18   : > { %s991_s22 = sshll.u32 %s296_s19, 5  ;;  %1023 = vmatpush3.bf16.msra.mxu0 %v1128_v2 }
  0x19   : > { %s302_s8 = scalar_lea.vmem %s1561_s0, %s991_s22  ;;  %1024 = vmatprep.subr.bf16.mxu0 %v1129_v3  ;;  %s871_s22 = scalar_lea.sflag [#allocation4], %s292_s16 }
  0x1a   : > { %v1134_v4 = vld [vmem:[%s302_s8] sm:$0xff]   ;;  %v1135_v9 = vld [vmem:[%s302_s8 + $0x8] sm:$0xff]   ;;  %v1136_v10 = vld [vmem:[%s302_s8 + $0x10] sm:$0xff]  }
  0x1b   : > { %1034 = vmatprep.mubr.bf16.mxu0 %v1134_v4  ;;  %v1137_v11 = vld [vmem:[%s302_s8 + $0x18] sm:$0xff]   ;;  %s988_s8 = sshll.u32 %s1310_s27, 4  ;;  %s1321_s27 = smov [#allocation3]  }
  0x1c   : > { %1025 = vmatpush3.bf16.msra.mxu0 %v1129_v3  ;;  %s1514_s21 = scalar_lea.hbm %s1568_s7, %s988_s8  ;;  %s1244_s30 = sshll.u32 %s1321_s27, 4  ;;  %s1245_s30 = int_to_ptr.vmem [resolvable:$false] %s1244_s30 }
  0x1d   : > { %1026 = vmatprep.subr.bf16.mxu0 %v1130_v5  ;;  %s1246_s10 = scalar_lea.vmem %s1245_s30, 32  ;;  %p1247_p1 = scmp.lt.s32.totalorder %s1516_s18, %s1245_s30 }
  0x1e   : > { %p1248_p2 = scmp.lt.s32.totalorder %s1246_s10, %s1240_s23 }
  0x20   : > { %1027 = vmatpush3.bf16.msra.mxu0 %v1130_v5  ;;  %p1249_p3 = por %p1248_p2, %p1247_p1 }
  0x21   : > { %1028 = vmatprep.subr.bf16.mxu0 %v1131_v6 }
  0x22   : > { %p1250_p5 = pnand %p1249_p3, %p1243_p0 }
  0x24   : > { %1029 = vmatpush3.bf16.msra.mxu0 %v1131_v6 }
  0x25   : > { %1030 = vmatprep.subr.bf16.mxu0 %v1132_v7 }
  0x28   : > { %1031 = vmatpush3.bf16.msra.mxu0 %v1132_v7 }
  0x29   : > { %1032 = vmatprep.subr.bf16.mxu0 %v1133_v8 }
  0x2c   : > { %1033 = vmatpush3.bf16.msra.mxu0 %v1133_v8 }
  0x2f   : > { %1035 = vmatmul.mubr.bf16.vlgmr.msra.gmra.mrb[0].mxu0 %v1135_v9 }
  0x30   : > { %1038 = vmatprep.mubr.bf16.mxu0 %v1136_v10 }
  0x37   : > { %1039 = vmatmul.mubr.bf16.gmra.mrb[4].mxu0 %v1137_v11 }
 0x102   : > { %v1036_v15 = vpop.f32.mrb[0].mxu0 }
 0x103   : > { %v1455_v16 = vadd.f32 %v1036_v15, %v959_v14  ;;  %v447_v17 = vpop.f32.mrb[1].mxu0 }
 0x104   : > { %v1457_v18 = vadd.f32 %v959_v14, %v447_v17  ;;  %v1037_v19 = vpop.f32.mrb[2].mxu0 }
 0x105   : > { %v480_v20 = vsub.f32 0.0, %v1455_v16  ;;  %v1460_v21 = vadd.f32 %v1037_v19, %v959_v14  ;;  %v450_v22 = vpop.f32.mrb[3].mxu0 }
 0x106   : > { %v478_v23 = vsub.f32 0.0, %v1457_v18  ;;  %v451_v24 = vadd.f32 %v959_v14, %v450_v22  ;;  %v1143_v22 = vld [vmem:[%s1566_s5 + $0x18] sm:$0xff]  }
 0x107   : > { %v490_v25 = vmul.f32 1.442695, %v480_v20  ;;  %v481_v26 = vsub.f32 0.0, %v1460_v21  ;;  %v1141_v20 = vld [vmem:[%s1566_s5 + $0x8] sm:$0xff]  }
 0x108   : > { %v486_v27 = vmul.f32 1.442695, %v478_v23  ;;  %v479_v28 = vsub.f32 0.0, %v451_v24  ;;  %v972_v23 = vld [vmem:[%s1565_s4] ss:$0 sm:$0xff] }
 0x109   : > { %1144 = vpow2.f32 %v490_v25  ;;  %v492_v29 = vmul.f32 1.442695, %v481_v26 }
 0x10a   : > { %1146 = vpow2.f32 %v486_v27  ;;  %v488_v30 = vmul.f32 1.442695, %v479_v28  ;;  %v1040_v31 = vpop.f32.mrb[4].mxu0 }
 0x10b   : > { %1148 = vpow2.f32 %v492_v29  ;;  %v472_v32 = vadd.f32 %v1040_v31, %v959_v14  ;;  %v463_v33 = vpop.f32.mrb[5].mxu0 }
 0x10c   : > { %1150 = vpow2.f32 %v488_v30  ;;  %v464_v34 = vadd.f32 %v959_v14, %v463_v33  ;;  %v1041_v35 = vpop.f32.mrb[6].mxu0 }
 0x10d   : > { %v484_v36 = vsub.f32 0.0, %v472_v32  ;;  %v475_v37 = vadd.f32 %v1041_v35, %v959_v14  ;;  %v466_v38 = vpop.f32.mrb[7].mxu0 }
 0x10e   : > { %v482_v39 = vsub.f32 0.0, %v464_v34  ;;  %v467_v40 = vadd.f32 %v959_v14, %v466_v38 }
 0x10f   : > { %v498_v41 = vmul.f32 1.442695, %v484_v36  ;;  %v485_v42 = vsub.f32 0.0, %v475_v37 }
 0x110   : > { %v494_v43 = vmul.f32 1.442695, %v482_v39  ;;  %v483_v44 = vsub.f32 0.0, %v467_v40 }
 0x111   : > { %1152 = vpow2.f32 %v498_v41  ;;  %v500_v45 = vmul.f32 1.442695, %v485_v42 }
 0x112   : > { %1154 = vpow2.f32 %v494_v43  ;;  %v496_v46 = vmul.f32 1.442695, %v483_v44 }
 0x113   : > { %v1145_v47 = vpop.eup %1144  ;;  %1156 = vpow2.f32 %v500_v45 }
 0x114   : > { %v1147_v48 = vpop.eup %1146  ;;  %v504_v49 = vadd.f32 1.0, %v1145_v47  ;;  %1158 = vpow2.f32 %v496_v46 }
 0x115   : > { %v1149_v50 = vpop.eup %1148  ;;  %v502_v51 = vadd.f32 1.0, %v1147_v48 }
 0x116   : > { %v1151_v52 = vpop.eup %1150  ;;  %1160 = vrcp.f32 %v504_v49  ;;  %v505_v53 = vadd.f32 1.0, %v1149_v50 }
 0x117   : > { %1162 = vrcp.f32 %v502_v51  ;;  %v503_v54 = vadd.f32 1.0, %v1151_v52 }
 0x118   : > { %1164 = vrcp.f32 %v505_v53 }
 0x119   : > { %1166 = vrcp.f32 %v503_v54 }
 0x11b   : > { %v1153_v55 = vpop.eup %1152 }
 0x11c   : > { %v1155_v56 = vpop.eup %1154  ;;  %v508_v57 = vadd.f32 1.0, %v1153_v55 }
 0x11d   : > { %v1157_v58 = vpop.eup %1156  ;;  %v506_v59 = vadd.f32 1.0, %v1155_v56 }
 0x11e   : > { %v1159_v60 = vpop.eup %1158  ;;  %1168 = vrcp.f32 %v508_v57  ;;  %v509_v61 = vadd.f32 1.0, %v1157_v58 }
 0x11f   : > { %1170 = vrcp.f32 %v506_v59  ;;  %v507_v62 = vadd.f32 1.0, %v1159_v60 }
 0x120   : > { %v1161_v63 = vpop.eup %1160  ;;  %1172 = vrcp.f32 %v509_v61 }
 0x121   : > { %v1163_v0 = vpop.eup %1162  ;;  %1174 = vrcp.f32 %v507_v62  ;;  %v520_v3 = vmul.f32 %v1161_v63, %v1455_v16 }
 0x122   : > { %v1165_v1 = vpop.eup %1164  ;;  %v518_v5 = vmul.f32 %v1163_v0, %v1457_v18  ;;  %v1140_v18 = vld [vmem:[%s1566_s5] sm:$0xff]  }
 0x123   : > { %v1167_v2 = vpop.eup %1166  ;;  %v521_v4 = vmul.f32 %v1165_v1, %v1460_v21  ;;  %1054 = vmatprep.subr.bf16.mxu1 %v1140_v18  ;;  %v1142_v21 = vld [vmem:[%s1566_s5 + $0x10] sm:$0xff]  }
 0x124   : > { %v519_v6 = vmul.f32 %v1167_v2, %v451_v24 }
 0x125   : > { %v527_v7 = vpack.c.bf16 %v521_v4, %v520_v3 }
 0x126   : > { %v526_v8 = vpack.c.bf16 %v519_v6, %v518_v5 }
 0x128   : > { %v1169_v9 = vpop.eup %1168  ;;  %1046 = vmatprep.mubr.msk.bf16.mxu1 %vm553_vm0, %v526_v8 }
 0x129   : > { %v1171_v10 = vpop.eup %1170  ;;  %1047 = vmatmul.mubr.msk.bf16.vlgmr.msra.gmra.mrb[0].mxu1 %vm553_vm0, %v527_v7  ;;  %v524_v13 = vmul.f32 %v1169_v9, %v472_v32 }
 0x12a   : > { %v1173_v11 = vpop.eup %1172  ;;  %v522_v15 = vmul.f32 %v1171_v10, %v464_v34  ;;  %1055 = vmatpush3.bf16.msra.mxu1 %v1140_v18 }
 0x12b   : > { %v1175_v12 = vpop.eup %1174  ;;  %v525_v14 = vmul.f32 %v1173_v11, %v475_v37  ;;  %1056 = vmatprep.subr.bf16.mxu1 %v1141_v20 }
 0x12c   : > { %v523_v17 = vmul.f32 %v1175_v12, %v467_v40 }
 0x12d   : > { %v529_v19 = vpack.c.bf16 %v525_v14, %v524_v13 }
 0x12e   : > { %v528_v16 = vpack.c.bf16 %v523_v17, %v522_v15  ;;  %1057 = vmatpush3.bf16.msra.mxu1 %v1141_v20 }
 0x12f   : > { %1058 = vmatprep.subr.bf16.mxu1 %v1142_v21 }
 0x130   : > { %1050 = vmatprep.mubr.msk.bf16.mxu1 %vm553_vm0, %v528_v16 }
 0x131   : > { %1051 = vmatmul.mubr.msk.bf16.gmra.mrb[4].mxu1 %vm553_vm0, %v529_v19 }
 0x132   : > { %1059 = vmatpush3.bf16.msra.mxu1 %v1142_v21 }
 0x133   : > { %1060 = vmatprep.subr.bf16.mxu1 %v1143_v22 }
 0x136   : > { %1061 = vmatpush3.bf16.msra.mxu1 %v1143_v22 }
 0x1fc   : > { %v1048_v24 = vpop.f32.mrb[0].mxu1 }
 0x1fd   : > { %v1482_v25 = vadd.f32 %v1048_v24, %v972_v23  ;;  %v600_v26 = vpop.f32.mrb[1].mxu1 }
 0x1fe   : > { %v1484_v27 = vadd.f32 %v972_v23, %v600_v26  ;;  %v1049_v28 = vpop.f32.mrb[2].mxu1 }
 0x1ff   : > { %v633_v29 = vsub.f32 0.0, %v1482_v25  ;;  %v1487_v30 = vadd.f32 %v1049_v28, %v972_v23  ;;  %v603_v31 = vpop.f32.mrb[3].mxu1 }
 0x200   : > { %v631_v32 = vsub.f32 0.0, %v1484_v27  ;;  %v604_v33 = vadd.f32 %v972_v23, %v603_v31 }
 0x201   : > { %v643_v34 = vmul.f32 1.442695, %v633_v29  ;;  %v634_v35 = vsub.f32 0.0, %v1487_v30  ;;  %v1320_v29 = vmov 0.0  }
 0x202   : > { %v639_v36 = vmul.f32 1.442695, %v631_v32  ;;  %v632_v37 = vsub.f32 0.0, %v604_v33  ;;  %309 = vst [vmem:[#allocation2] sm:$0x1] %v1320_v29 }
 0x203   : > { %1176 = vpow2.f32 %v643_v34  ;;  %v645_v38 = vmul.f32 1.442695, %v634_v35 }
 0x204   : > { %1178 = vpow2.f32 %v639_v36  ;;  %v641_v39 = vmul.f32 1.442695, %v632_v37  ;;  %v1052_v40 = vpop.f32.mrb[4].mxu1 }
 0x205   : > { %1180 = vpow2.f32 %v645_v38  ;;  %v625_v41 = vadd.f32 %v1052_v40, %v972_v23  ;;  %v616_v42 = vpop.f32.mrb[5].mxu1 }
 0x206   : > { %1182 = vpow2.f32 %v641_v39  ;;  %v617_v43 = vadd.f32 %v972_v23, %v616_v42  ;;  %v1053_v44 = vpop.f32.mrb[6].mxu1 }
 0x207   : > { %v637_v45 = vsub.f32 0.0, %v625_v41  ;;  %v628_v46 = vadd.f32 %v1053_v44, %v972_v23  ;;  %v619_v47 = vpop.f32.mrb[7].mxu1 }
 0x208   : > { %v635_v48 = vsub.f32 0.0, %v617_v43  ;;  %v620_v49 = vadd.f32 %v972_v23, %v619_v47 }
 0x209   : > { %v651_v50 = vmul.f32 1.442695, %v637_v45  ;;  %v638_v51 = vsub.f32 0.0, %v628_v46 }
 0x20a   : > { %v647_v52 = vmul.f32 1.442695, %v635_v48  ;;  %v636_v53 = vsub.f32 0.0, %v620_v49 }
 0x20b   : > { %1184 = vpow2.f32 %v651_v50  ;;  %v653_v54 = vmul.f32 1.442695, %v638_v51 }
 0x20c   : > { %1186 = vpow2.f32 %v647_v52  ;;  %v649_v55 = vmul.f32 1.442695, %v636_v53 }
 0x20d   : > { %v1177_v56 = vpop.eup %1176  ;;  %1188 = vpow2.f32 %v653_v54 }
 0x20e   : > { %v1179_v57 = vpop.eup %1178  ;;  %v657_v58 = vadd.f32 1.0, %v1177_v56  ;;  %1190 = vpow2.f32 %v649_v55 }
 0x20f   : > { %v1181_v59 = vpop.eup %1180  ;;  %v655_v60 = vadd.f32 1.0, %v1179_v57 }
 0x210   : > { %v1183_v61 = vpop.eup %1182  ;;  %1192 = vrcp.f32 %v657_v58  ;;  %v658_v62 = vadd.f32 1.0, %v1181_v59 }
 0x211   : > { %1194 = vrcp.f32 %v655_v60  ;;  %v656_v63 = vadd.f32 1.0, %v1183_v61 }
 0x212   : > { %1196 = vrcp.f32 %v658_v62 }
 0x213   : > { %1198 = vrcp.f32 %v656_v63 }
 0x215   : > { %v1185_v0 = vpop.eup %1184 }
 0x216   : > { %v1187_v1 = vpop.eup %1186  ;;  %v661_v2 = vadd.f32 1.0, %v1185_v0 }
 0x217   : > { %v1189_v3 = vpop.eup %1188  ;;  %v659_v4 = vadd.f32 1.0, %v1187_v1 }
 0x218   : > { %v1191_v5 = vpop.eup %1190  ;;  %1200 = vrcp.f32 %v661_v2  ;;  %v662_v6 = vadd.f32 1.0, %v1189_v3 }
 0x219   : > { %1202 = vrcp.f32 %v659_v4  ;;  %v660_v7 = vadd.f32 1.0, %v1191_v5 }
 0x21a   : > { %v1193_v8 = vpop.eup %1192  ;;  %1204 = vrcp.f32 %v662_v6 }
 0x21b   : > { %v1195_v9 = vpop.eup %1194  ;;  %1206 = vrcp.f32 %v660_v7  ;;  %v673_v12 = vmul.f32 %v1193_v8, %v1482_v25 }
 0x21c   : > { %v1197_v10 = vpop.eup %1196  ;;  %v671_v14 = vmul.f32 %v1195_v9, %v1484_v27  ;;  %v979_v27 = vld [vmem:[%s1567_s6] ss:$0 sm:$0xff] }
 0x21d   : > { %v1199_v11 = vpop.eup %1198  ;;  %v674_v13 = vmul.f32 %v1197_v10, %v1487_v30 }
 0x21e   : > { %v672_v15 = vmul.f32 %v1199_v11, %v604_v33 }
 0x21f   : > { %v680_v17 = vpack.c.bf16 %v674_v13, %v673_v12 }
 0x220   : > { %v679_v19 = vpack.c.bf16 %v672_v15, %v671_v14 }
 0x222   : > { %v1201_v16 = vpop.eup %1200  ;;  %1062 = vmatprep.mubr.msk.bf16.mxu1 %vm722_vm1, %v679_v19 }
 0x223   : > { %v1203_v18 = vpop.eup %1202  ;;  %1063 = vmatmul.mubr.msk.bf16.vlgmr.msra.gmra.mrb[8].mxu1 %vm722_vm1, %v680_v17  ;;  %v677_v22 = vmul.f32 %v1201_v16, %v625_v41 }
 0x224   : > { %v1205_v20 = vpop.eup %1204  ;;  %v675_v24 = vmul.f32 %v1203_v18, %v617_v43 }
 0x225   : > { %v1207_v21 = vpop.eup %1206  ;;  %v678_v23 = vmul.f32 %v1205_v20, %v628_v46 }
 0x226   : > { %v676_v26 = vmul.f32 %v1207_v21, %v620_v49 }
 0x227   : > { %v682_v28 = vpack.c.bf16 %v678_v23, %v677_v22 }
 0x228   : > { %v681_v25 = vpack.c.bf16 %v676_v26, %v675_v24 }
 0x22a   : > { %1066 = vmatprep.mubr.msk.bf16.mxu1 %vm722_vm1, %v681_v25 }
 0x22b   : > { %1067 = vmatmul.mubr.msk.bf16.gmra.mrb[12].mxu1 %vm722_vm1, %v682_v28 }
 0x2f6   : > { %v1064_v30 = vpop.f32.mrb[8].mxu1 }
 0x2f7   : > { %v1497_v31 = vadd.f32 %v1064_v30, %v979_v27  ;;  %v769_v32 = vpop.f32.mrb[9].mxu1 }
 0x2f8   : > { %v1499_v33 = vadd.f32 %v979_v27, %v769_v32  ;;  %v1065_v34 = vpop.f32.mrb[10].mxu1 }
 0x2f9   : > { %v802_v35 = vsub.f32 0.0, %v1497_v31  ;;  %v1502_v36 = vadd.f32 %v1065_v34, %v979_v27  ;;  %v772_v37 = vpop.f32.mrb[11].mxu1 }
 0x2fa   : > { %v800_v38 = vsub.f32 0.0, %v1499_v33  ;;  %v773_v39 = vadd.f32 %v979_v27, %v772_v37 }
 0x2fb   : > { %v812_v40 = vmul.f32 1.442695, %v802_v35  ;;  %v803_v41 = vsub.f32 0.0, %v1502_v36 }
 0x2fc   : > { %v808_v42 = vmul.f32 1.442695, %v800_v38  ;;  %v801_v43 = vsub.f32 0.0, %v773_v39 }
 0x2fd   : > { %1208 = vpow2.f32 %v812_v40  ;;  %v814_v44 = vmul.f32 1.442695, %v803_v41 }
 0x2fe   : > { %1210 = vpow2.f32 %v808_v42  ;;  %v810_v45 = vmul.f32 1.442695, %v801_v43  ;;  %v1068_v46 = vpop.f32.mrb[12].mxu1  ;;  %v848_v42 = vld [vmem:[#allocation2] sm:$0x1] }
 0x2ff   : > { %1212 = vpow2.f32 %v814_v44  ;;  %v794_v47 = vadd.f32 %v1068_v46, %v979_v27  ;;  %v785_v48 = vpop.f32.mrb[13].mxu1 }
 0x300   : > { %1214 = vpow2.f32 %v810_v45  ;;  %v786_v49 = vadd.f32 %v979_v27, %v785_v48  ;;  %v1069_v50 = vpop.f32.mrb[14].mxu1 }
 0x301   : > { %v806_v51 = vsub.f32 0.0, %v794_v47  ;;  %v797_v52 = vadd.f32 %v1069_v50, %v979_v27  ;;  %v788_v53 = vpop.f32.mrb[15].mxu1 }
 0x302   : > { %v804_v54 = vsub.f32 0.0, %v786_v49  ;;  %v789_v55 = vadd.f32 %v979_v27, %v788_v53 }
 0x303   : > { %v820_v56 = vmul.f32 1.442695, %v806_v51  ;;  %v807_v57 = vsub.f32 0.0, %v797_v52 }
 0x304   : > { %v816_v58 = vmul.f32 1.442695, %v804_v54  ;;  %v805_v59 = vsub.f32 0.0, %v789_v55 }
 0x305   : > { %1216 = vpow2.f32 %v820_v56  ;;  %v822_v60 = vmul.f32 1.442695, %v807_v57 }
 0x306   : > { %1218 = vpow2.f32 %v816_v58  ;;  %v818_v61 = vmul.f32 1.442695, %v805_v59 }
 0x307   : > { %v1209_v62 = vpop.eup %1208  ;;  %1220 = vpow2.f32 %v822_v60 }
 0x308   : > { %v1211_v63 = vpop.eup %1210  ;;  %v826_v0 = vadd.f32 1.0, %v1209_v62  ;;  %1222 = vpow2.f32 %v818_v61 }
 0x309   : > { %v1213_v1 = vpop.eup %1212  ;;  %v824_v2 = vadd.f32 1.0, %v1211_v63 }
 0x30a   : > { %v1215_v3 = vpop.eup %1214  ;;  %v827_v4 = vadd.f32 1.0, %v1213_v1 }
 0x30b   : > { %1224 = vrcp.f32 %v824_v2  ;;  %v825_v5 = vadd.f32 1.0, %v1215_v3 }
 0x30c   : > { %1226 = vrcp.f32 %v826_v0 }
 0x30d   : > { %1228 = vrcp.f32 %v825_v5 }
 0x30e   : > { %1230 = vrcp.f32 %v827_v4 }
 0x30f   : > { %v1217_v6 = vpop.eup %1216 }
 0x310   : > { %v1219_v7 = vpop.eup %1218  ;;  %v830_v8 = vadd.f32 1.0, %v1217_v6 }
 0x311   : > { %v1221_v9 = vpop.eup %1220  ;;  %v828_v10 = vadd.f32 1.0, %v1219_v7 }
 0x312   : > { %v1223_v11 = vpop.eup %1222  ;;  %v831_v12 = vadd.f32 1.0, %v1221_v9 }
 0x313   : > { %1232 = vrcp.f32 %v828_v10  ;;  %v829_v13 = vadd.f32 1.0, %v1223_v11 }
 0x314   : > { %1234 = vrcp.f32 %v830_v8 }
 0x315   : > { %v1225_v14 = vpop.eup %1224  ;;  %1236 = vrcp.f32 %v829_v13 }
 0x316   : > { %v1227_v15 = vpop.eup %1226  ;;  %1238 = vrcp.f32 %v831_v12  ;;  %v840_v19 = vmul.f32 %v1225_v14, %v1499_v33 }
 0x317   : > { %v1229_v17 = vpop.eup %1228  ;;  %v842_v20 = vmul.f32 %v1227_v15, %v1497_v31 }
 0x318   : > { %v841_v16 = vmul.f32 %v1229_v17, %v773_v39  ;;  %v1231_v18 = vpop.eup %1230 }
 0x319   : > { %v843_v22 = vmul.f32 %v1231_v18, %v1502_v36 }
 0x31a   : > { %v849_v21 = vadd.f32 %v841_v16, %v840_v19 }
 0x31c   : > { %v850_v23 = vadd.f32 %v849_v21, %v842_v20 }
 0x31d   : > { %v1233_v24 = vpop.eup %1232 }
 0x31e   : > { %v1235_v26 = vpop.eup %1234  ;;  %v844_v28 = vmul.f32 %v1233_v24, %v786_v49  ;;  %v851_v25 = vadd.f32 %v850_v23, %v843_v22 }
 0x31f   : > { %v1237_v29 = vpop.eup %1236  ;;  %v846_v34 = vmul.f32 %v1235_v26, %v794_v47 }
 0x320   : > { %v852_v27 = vadd.f32 %v851_v25, %v844_v28  ;;  %v845_v30 = vmul.f32 %v1237_v29, %v789_v55  ;;  %v1239_v32 = vpop.eup %1238 }
 0x321   : > { %v847_v35 = vmul.f32 %v1239_v32, %v797_v52 }
 0x322   : > { %v853_v33 = vadd.f32 %v852_v27, %v845_v30 }
 0x324   : > { %v854_v37 = vadd.f32 %v853_v33, %v846_v34 }
 0x326   : > { %v855_v38 = vadd.f32 %v854_v37, %v847_v35 }
 0x328   : > { %v856_v31 = vrot.slane %v855_v38, 4 }
 0x32a   : > { %v857_v39 = vadd.f32 %v856_v31, %v855_v38 }
 0x32c   : > { %v858_v40 = vrot.slane %v857_v39, 2 }
 0x32e   : > { %v859_v36 = vadd.f32 %v858_v40, %v857_v39 }
 0x330   : > { %v860_v41 = vrot.slane %v859_v36, 1 }
 0x332   : > { %v861_v43 = vadd.f32 %v860_v41, %v859_v36 }
 0x334   : > { %v862_v44 = vadd.f32 %v861_v43, %v848_v42 }
 0x336   : > { %863 = vst [vmem:[#allocation2] sm:$0x1] %v862_v44 }
 0x33d   : > { %v867_v45 = vld [vmem:[#allocation2] sm:$0x1] }
 0x33e   : > { %v868_v46 = vmul.f32 0.015625, %v867_v45 }
 0x340   : > { %869 = vst [vmem:[%s293_s17] sm:$0x1] %v868_v46 }
 0x341   : > { %1253 = shalt.err (!%p1250_p5)
}
 0x342   : > { %s1254_s12 = scalar_lea.hbm %s1514_s21, 16  ;;  %s1258_s8 = scalar_lea.hbm %s1568_s7, 32 }
 0x343   : > { %p1255_p6 = scmp.ne.s32.totalorder %s1514_s21, %s1254_s12  ;;  %p1259_p10 = scmp.lt.u32.totalorder %s1514_s21, %s1568_s7 }
 0x344   : > { %p1260_p11 = scmp.lt.u32.totalorder %s1258_s8, %s1254_s12  ;;  %p1262_p13 = scmp.lt.u32.totalorder %s1254_s12, %s1514_s21 }
 0x345   : > { %p1256_p7 = pnand %p1255_p6, %p1402_p4 }
 0x346   : > { %p1261_p12 = por %p1260_p11, %p1259_p10 }
 0x347   : > { %p1257_p9 = pneg %p1256_p7 }
 0x348   : > { %p1263_p0 = por %p1262_p13, %p1261_p12 }
 0x34a   : > { %p1264_p1 = pnand %p1263_p0, %p1257_p9 }
 0x34c   : > { %1267 = shalt.err (!%p1264_p1)
}
 0x34d   : > { %1070 = dma.vmem_to_hbm [thread:$0]  (%p1402_p4), %s1516_s18, 16, %s1514_s21, %s871_s22  }
 0x34e PF: > { %p1076_p2 = scmp.ge.s32.totalorder %s1318_s29, 2  ;;  %s895_s20 = sand.u32 1, %s1298_s24  }
 0x34f   : > { %s896_s23 = scalar_lea.sflag [#allocation4], %s895_s20 }
 0x350   : > { %p1073_p3 = pnand %p1076_p2, %p1409_p8 }
 0x352   : > { %1293 = dma.done.wait (!%p1073_p3), %s896_s23, 16  }
 0x353   : > { %1295 = vsyncadd (!%p1073_p3), %s896_s23, 4294967280  ;;  %s20_s29 = sadd.s32 1, %s1318_s29   ;;  %s1571_s24 = smov %s1302_s25 }
 0x354   : > { %p17_p5 = scmp.ge.s32.totalorder %s20_s29, 4   ;;  %s1572_s25 = smov %s1306_s26 }
 0x355   : > { %s1573_s26 = smov %s1415_s14  ;;  %s1574_s27 = smov %s1314_s28 }
 0x356   : > { %s1575_s28 = smov %s1577_s9  ;;  %19 = sbr.rel (!%p17_p5) target bundleno = 4 (0x4), region = 91 }
 0x35d   :  { %900 = vsyncpa [#allocation4], 1 }
 0x35e   :  { %902 = vsyncpa [#allocation4 + $0x1], 1 }

</bundles_post_ra>
